<compile_context>
chip_gen: v5e
topology: v5e:2x2
jax: 0.10.0
libtpu: 0.0.40
codegen_flags: <defaults>
</compile_context>

<pallas_src>
import functools

import jax
import jax.numpy as jnp
from jax import lax
from jax.experimental import pallas as pl
from jax.experimental.pallas import tpu as pltpu


def _maxpool_stride1_kernel(x_ref, o_ref, *, size, pad1, H, W):
    # x_ref / o_ref: (tile_bc, H*W) in VMEM; lane axis = flattened H*W.
    x = x_ref[...]
    HW = H * W
    n_pos = size - 1 - pad1   # offsets toward +inf (right / bottom)
    n_neg = pad1              # offsets toward -inf (left / top)

    # Edge masks, hoisted: computed once per block (cheap VPU int ops), and only the
    # ones this `size` actually needs.
    flat = lax.broadcasted_iota(jnp.int32, x.shape, 1)
    col = flat % W
    last_col = (col == W - 1) if n_pos > 0 else None
    last_row = (flat >= (H - 1) * W) if n_pos > 0 else None
    first_col = (col == 0) if n_neg > 0 else None
    first_row = (flat < W) if n_neg > 0 else None

    def shift_w(v, d):
        # y[.., (r, c)] = v[.., (r, clamp(c + d))], d in {+1, -1}
        rolled = pltpu.roll(v, shift=(-d) % HW, axis=1)
        edge = last_col if d > 0 else first_col
        return jnp.where(edge, v, rolled)

    def shift_h(v, d):
        # y[.., (r, c)] = v[.., (clamp(r + d), c)], d in {+1, -1}
        rolled = pltpu.roll(v, shift=(-d * W) % HW, axis=1)
        edge = last_row if d > 0 else first_row
        return jnp.where(edge, v, rolled)

    def running_max(v, shift_fn):
        # Composed clamped shifts reproduce replicate padding exactly:
        # after k clamped +1 shifts, element c holds v[min(c + k, edge)].
        m = v
        cur = v
        for _ in range(n_pos):
            cur = shift_fn(cur, +1)
            m = jnp.maximum(m, cur)
        cur = v
        for _ in range(n_neg):
            cur = shift_fn(cur, -1)
            m = jnp.maximum(m, cur)
        return m

    # Separable max: W pass, then H pass on the row-max.
    o_ref[...] = running_max(running_max(x, shift_w), shift_h)


def _pick_tile_bc(BC, row_bytes):
    """Rows (of B*C) per block: ~2 MiB blocks, multiple of 8 sublanes (or full extent),
    and enough grid steps for DMA pipelining / v7x megacore sharding when BC allows."""
    target_block_bytes = 2 * 1024 * 1024
    tile = max(1, target_block_bytes // row_bytes)
    tile = min(tile, BC)
    if BC >= 16:
        # Aim for several grid steps so the pipeline has work to overlap and the
        # "parallel" axis can be split across v7x's 2 TensorCores.
        tile = min(tile, max(8, pl.cdiv(BC, 8)))
    if tile < BC:
        # Sublane tiling rule: second-minor block dim multiple of 8 (or full extent).
        tile = min(BC, max(8, (tile // 8) * 8))
    return int(tile)


def max_pool_stride1(x, size=2):
    """NCHW equivalent of MaxPoolStride1.forward."""
    pad1 = (size - 1) // 2
    B, C, H, W = x.shape
    BC, HW = B * C, H * W
    xf = x.reshape(BC, HW)          # contiguous -> free; lane axis = H*W (lane-dense)

    row_bytes = HW * jnp.dtype(x.dtype).itemsize
    tile_bc = _pick_tile_bc(BC, row_bytes)
    # Ragged tail is safe: rows are independent (shifts only along H*W) and Pallas
    # masks the out-of-range part of the final block's write-back.
    grid_bc = pl.cdiv(BC, tile_bc)

    block_bytes = tile_bc * row_bytes
    # Input + output each double-buffered -> ~4 live blocks; add headroom.
    vmem_limit = int(max(32 * 1024 * 1024, 4 * block_bytes + (4 << 20)))

    kernel = functools.partial(
        _maxpool_stride1_kernel, size=size, pad1=pad1, H=H, W=W)
    out = pl.pallas_call(
        kernel,
        out_shape=jax.ShapeDtypeStruct((BC, HW), x.dtype),
        grid_spec=pltpu.PrefetchScalarGridSpec(
            num_scalar_prefetch=0,
            grid=(grid_bc,),
            in_specs=[pl.BlockSpec((tile_bc, HW), lambda i: (i, 0))],
            out_specs=pl.BlockSpec((tile_bc, HW), lambda i: (i, 0)),
        ),
        compiler_params=pltpu.CompilerParams(
            dimension_semantics=("parallel",),
            vmem_limit_bytes=vmem_limit,
        ),
        # NOTE: input_output_aliases={0: 0} would halve the HBM footprint (block-local
        # in-place is safe) but donates the caller's buffer; intentionally omitted.
    )(xf)
    return out.reshape(B, C, H, W)


def _reference_max_pool_stride1(x, size=2):
    """Pure-JAX reference mirroring the PyTorch semantics."""
    pad1 = (size - 1) // 2
    pad2 = pad1 if (size - 1) % 2 == 0 else pad1 + 1
    xp = jnp.pad(x, ((0, 0), (0, 0), (pad1, pad2), (pad1, pad2)), mode="edge")
    B, C, H, W = x.shape
    out = xp[:, :, :H, :W]
    for di in range(size):
        for dj in range(size):
            out = jnp.maximum(out, xp[:, :, di:di + H, dj:dj + W])
    return out


if __name__ == "__main__":
    key = jax.random.PRNGKey(0)
    B, C, H, W = 2, 4, 16, 16
    x = jax.random.normal(key, (B, C, H, W), dtype=jnp.float32)

    ok = True
    for size in (2, 3):   # even (asymmetric pad) and odd (symmetric pad) windows
        y = max_pool_stride1(x, size=size)
        y = jax.block_until_ready(y)
        y_ref = _reference_max_pool_stride1(x, size=size)
        ok = ok and (y.shape == (B, C, H, W)) and bool(jnp.allclose(y, y_ref))

    assert ok, "Pallas output mismatch vs reference"
    print("KERNEL_OK")
</pallas_src>

<mosaic_0001>
module attributes {stable_mosaic.version = 11 : i64} {
  func.func @_maxpool_stride1_kernel(%arg0: i32, %arg1: memref<8x256xf32, #tpu.memory_space<vmem>>, %arg2: memref<8x256xf32, #tpu.memory_space<vmem>>) attributes {dimension_semantics = [#tpu.dimension_semantics<parallel>], iteration_bounds = array<i64: 1>, scalar_prefetch = 0 : i64, scratch_operands = 0 : i64, tpu.core_type = #tpu.core_type<tc>, window_params = [{transform_indices = @transform_0, window_bounds = array<i64: 8, 256>}, {transform_indices = @transform_1, window_bounds = array<i64: 8, 256>}]} {
    %c0 = arith.constant 0 : index
    %c0_0 = arith.constant 0 : index
    %0 = vector.load %arg1[%c0, %c0_0] : memref<8x256xf32, #tpu.memory_space<vmem>>, vector<8x256xf32>
    %1 = tpu.iota {dimensions = array<i32: 1>} : vector<8x256xi32>
    %c16_i32 = arith.constant 16 : i32
    %c0_i32 = arith.constant 0 : i32
    %2 = arith.cmpi eq, %c16_i32, %c0_i32 : i32
    %c1_i32 = arith.constant 1 : i32
    %3 = arith.select %2, %c1_i32, %c16_i32 : i32
    %4 = vector.broadcast %3 : i32 to vector<8x256xi32>
    %5 = arith.remsi %1, %4 : vector<8x256xi32>
    %c0_i32_1 = arith.constant 0 : i32
    %6 = vector.broadcast %c0_i32_1 : i32 to vector<8x256xi32>
    %7 = arith.cmpi ne, %5, %6 : vector<8x256xi32>
    %c0_i32_2 = arith.constant 0 : i32
    %8 = vector.broadcast %c0_i32_2 : i32 to vector<8x256xi32>
    %9 = arith.cmpi slt, %5, %8 : vector<8x256xi32>
    %c0_i32_3 = arith.constant 0 : i32
    %10 = arith.cmpi slt, %3, %c0_i32_3 : i32
    %11 = vector.broadcast %10 : i1 to vector<8x256xi1>
    %12 = vector.broadcast %11 : vector<8x256xi1> to vector<8x256xi1>
    %13 = arith.xori %9, %12 : vector<8x256xi1>
    %14 = arith.andi %13, %7 : vector<8x256xi1>
    %15 = vector.broadcast %3 : i32 to vector<8x256xi32>
    %16 = arith.addi %5, %15 : vector<8x256xi32>
    %17 = arith.select %14, %16, %5 : vector<8x256xi1>, vector<8x256xi32>
    %c15_i32 = arith.constant 15 : i32
    %18 = vector.broadcast %c15_i32 : i32 to vector<8x256xi32>
    %19 = arith.cmpi eq, %17, %18 : vector<8x256xi32>
    %c240_i32 = arith.constant 240 : i32
    %20 = vector.broadcast %c240_i32 : i32 to vector<8x256xi32>
    %21 = arith.cmpi sge, %1, %20 : vector<8x256xi32>
    %c255_i32 = arith.constant 255 : i32
    %22 = tpu.dynamic_rotate %0 by %c255_i32 dim 1 : vector<8x256xf32>, i32 -> vector<8x256xf32>
    %23 = arith.select %19, %0, %22 : vector<8x256xi1>, vector<8x256xf32>
    %24 = arith.maximumf %0, %23 : vector<8x256xf32>
    %c240_i32_4 = arith.constant 240 : i32
    %25 = tpu.dynamic_rotate %24 by %c240_i32_4 dim 1 : vector<8x256xf32>, i32 -> vector<8x256xf32>
    %26 = arith.select %21, %24, %25 : vector<8x256xi1>, vector<8x256xf32>
    %27 = arith.maximumf %24, %26 : vector<8x256xf32>
    %c0_5 = arith.constant 0 : index
    %c0_6 = arith.constant 0 : index
    %28 = vector.load %arg2[%c0_5, %c0_6] : memref<8x256xf32, #tpu.memory_space<vmem>>, vector<8x256xf32>
    tpu.vector_store %arg2[%c0_5, %c0_6], %27 {strides = array<i32>} : memref<8x256xf32, #tpu.memory_space<vmem>>, vector<8x256xf32>,
    return
  }
  func.func @transform_0(%arg0: i32) -> (i32, i32) {
    %c0_i32 = arith.constant 0 : i32
    %c0_i32_0 = arith.constant 0 : i32
    return %arg0, %c0_i32 : i32, i32
  }
  func.func @transform_1(%arg0: i32) -> (i32, i32) {
    %c0_i32 = arith.constant 0 : i32
    %c0_i32_0 = arith.constant 0 : i32
    return %arg0, %c0_i32 : i32, i32
  }
}

</mosaic_0001>

<bundles_post_ra>
// kernel: tpu_custom_call.1
= control target key start
LH: loop header
LB: loop body
LE: loop exit
PB: predicated region body
PF: predicated region fallthrough
CT: control target
= control target key end

     0   :  { %6 = vsyncpa [#allocation3], 0  ;;  %s173_s0 = inlined_call_operand.hbm [shape: f32[8,256], index: 0, kind: input, shape index: {}]   ;;  %s174_s1 = inlined_call_operand.hbm [shape: f32[8,256], index: 1, kind: output, shape index: {}]  }
   0x1   :  { %7 = vsyncpa [#allocation4], 0  ;;  %s13_s8 = sshll.u32 %s173_s0, 4  ;;  %s153_s9 = smov [#allocation2]   ;;  %s14_s8 = int_to_ptr.hbm [resolvable:$true] %s13_s8 }
   0x2   :  { %s15_s10 = sshll.u32 %s153_s9, 4  ;;  %s16_s10 = int_to_ptr.vmem [resolvable:$true] %s15_s10 }
   0x3   :  { %18 = dma.hbm_to_vmem [thread:$0]  %s14_s8, 256, %s16_s10, [#allocation3]  }
   0x4   :  { %149 = dma.done.wait [#allocation3], 256  }
   0x5   :  { %150 = vsyncadd [#allocation3], 4294967040  ;;  %v23_v0 = vld [vmem:[#allocation2] sm:$0xff]  ;;  %s154_s11 = smov 127   ;;  %v24_v1 = vld [vmem:[#allocation2 + $0x8] sm:$0xff]  ;;  %v25_v2 = vlaneseq  ;;  %s155_s0 = smov 112  }
   0x6   :  { %56 = vrot.lane.b32.xlu0 %v23_v0, %s154_s11  ;;  %s156_s12 = smov [#allocation5]   ;;  %s87_s16 = sshll.u32 %s174_s1, 4  ;;  %s88_s16 = int_to_ptr.hbm [resolvable:$true] %s87_s16 }
   0x7   :  { %v26_v4 = vand.u32 127, %v25_v2  ;;  %s85_s13 = sshll.u32 %s156_s12, 4  ;;  %s86_s13 = int_to_ptr.vmem [resolvable:$true] %s85_s13 }
   0x9   :  { %v32_v5 = vand.u32 15, %v26_v4  ;;  %v27_v6 = vadd.s32 128, %v26_v4  ;;  %vm60_vm0 = vcmp.lt.s32.totalorder %v26_v4, 127  ;;  %vm71_vm3 = vcmp.lt.s32.totalorder %v26_v4, 112 }
   0xb   :  { %vm52_vm1 = vcmp.eq.s32.totalorder %v32_v5, 15  ;;  %v39_v8 = vand.u32 15, %v27_v6  ;;  %vm55_vm4 = vcmp.ge.s32.totalorder %v27_v6, 240 }
   0xd   :  { %vm53_vm2 = vcmp.eq.s32.totalorder %v39_v8, 15 }
   0xe   :  { %58 = vrot.lane.b32.xlu0 %v24_v1, %s154_s11 }
  0x78   :  { %v57_v3 = vpop.permute.xlu0 %56 }
  0x80   :  { %v59_v7 = vpop.permute.xlu0 %58 }
  0x81   :  { %v61_v9 = vsel %vm60_vm0, %v57_v3, %v59_v7  ;;  %v62_v12 = vsel %vm60_vm0, %v59_v7, %v57_v3 }
  0x82   :  { %v63_v10 = vsel %vm52_vm1, %v23_v0, %v61_v9  ;;  %v64_v13 = vsel %vm53_vm2, %v24_v1, %v62_v12 }
  0x83   :  { %v65_v11 = vmax.f32 %v23_v0, %v63_v10  ;;  %v66_v14 = vmax.f32 %v24_v1, %v64_v13 }
  0x85   :  { %67 = vrot.lane.b32.xlu1 %v65_v11, %s155_s0 }
  0x8d   :  { %69 = vrot.lane.b32.xlu1 %v66_v14, %s155_s0 }
  0xf7   :  { %v68_v15 = vpop.permute.xlu1 %67 }
  0xff   :  { %v70_v16 = vpop.permute.xlu1 %69 }
 0x100   :  { %v72_v17 = vsel %vm71_vm3, %v68_v15, %v70_v16  ;;  %v73_v18 = vsel %vm71_vm3, %v70_v16, %v68_v15 }
 0x101   :  { %v75_v19 = vsel %vm55_vm4, %v66_v14, %v73_v18  ;;  %v76_v20 = vmax.f32 %v65_v11, %v72_v17 }
 0x102   :  { %v77_v21 = vmax.f32 %v66_v14, %v75_v19 }
 0x103   :  { %78 = vst [vmem:[#allocation5] sm:$0xff] %v76_v20 }
 0x104   :  { %79 = vst [vmem:[#allocation5 + $0x8] sm:$0xff] %v77_v21 }
 0x105   :  { %90 = dma.vmem_to_hbm [thread:$0]  %s86_s13, 256, %s88_s16, [#allocation4]  }
 0x106   :  { %151 = dma.done.wait [#allocation4], 256  }
 0x107   :  { %152 = vsyncadd [#allocation4], 4294967040 }
 0x108   :  { %95 = vsyncpa [#allocation3], 1 }
 0x109   :  { %96 = vsyncpa [#allocation4], 1 }

</bundles_post_ra>
